<compile_context>
chip_gen: v7x
topology: tpu7x:2x2x1
jax: 0.10.0
libtpu: 0.0.40
codegen_flags: <defaults>
</compile_context>

<pallas_src>
import math

import jax
import jax.numpy as jnp
from jax.experimental import pallas as pl
from jax.experimental.pallas import tpu as pltpu


# --------------------------------------------------------------------------- #
# Host-side construction of the blur operators (static Python floats).
# --------------------------------------------------------------------------- #
def _gaussian_kernel1d(kernel_size: int, sigma: float):
    # Matches kornia.filters.get_gaussian_kernel1d (normalized Gaussian taps).
    xs = [i - kernel_size // 2 for i in range(kernel_size)]
    if kernel_size % 2 == 0:
        xs = [v + 0.5 for v in xs]
    g = [math.exp(-(v * v) / (2.0 * sigma * sigma)) for v in xs]
    s = sum(g)
    return [v / s for v in g]


def _reflect_index(t: int, size: int) -> int:
    # 'reflect' border (no edge repetition), assumes kernel_size//2 < size.
    if t < 0:
        return -t
    if t >= size:
        return 2 * (size - 1) - t
    return t


def _reflect_conv_matrix(size: int, kernel_size: int, sigma: float):
    """M[out, in]: 1-D Gaussian convolution with reflect padding as a matrix."""
    w = _gaussian_kernel1d(kernel_size, sigma)
    pad = kernel_size // 2
    mat = [[0.0] * size for _ in range(size)]
    for o in range(size):
        for j in range(kernel_size):
            t = _reflect_index(o - pad + j, size)
            mat[o][t] += w[j]
    return mat


def _largest_divisor(n: int, cap: int) -> int:
    best = 1
    for d in range(1, min(n, cap) + 1):
        if n % d == 0:
            best = d
    return best


# --------------------------------------------------------------------------- #
# Kernel: one batch of B planes per grid step, blur = Bh @ X @ Bw on the MXU.
# --------------------------------------------------------------------------- #
def _make_blur_kernel(num_planes: int):
    def kernel(x_ref, bh_ref, bw_ref, o_ref):
        bh = bh_ref[...]  # (H, H)  float32, [out, in]
        bw = bw_ref[...]  # (W, W)  float32, [in, out]
        for b in range(num_planes):  # static unroll over the plane batch
            plane = x_ref[b].astype(jnp.float32)                      # (H, W)
            tmp = jnp.dot(plane, bw,
                          preferred_element_type=jnp.float32,
                          precision=jax.lax.Precision.HIGHEST)        # horizontal
            out = jnp.dot(bh, tmp,
                          preferred_element_type=jnp.float32,
                          precision=jax.lax.Precision.HIGHEST)        # vertical
            o_ref[b] = out.astype(o_ref.dtype)

    return kernel


def gaussian_blur(x: jax.Array, kernel_size: int, sigma: float,
                  max_planes_per_step: int = 32) -> jax.Array:
    """Equivalent of GaussainBluer(kernel_size, sigma)(x) for x in NCHW."""
    N, C, H, W = x.shape
    P = N * C
    pad = kernel_size // 2
    assert pad < H and pad < W, "reflect padding requires kernel_size//2 < H, W"
    # TODO(synk): even kernel_size uses kornia's half-offset taps; only odd sizes
    # are exercised/validated here (kornia itself requires odd kernels).

    # Reflect-padded separable blur as two dense banded matrices.
    bh = jnp.asarray(_reflect_conv_matrix(H, kernel_size, sigma),
                     dtype=jnp.float32)                       # (H_out, H_in)
    bw = jnp.asarray(_reflect_conv_matrix(W, kernel_size, sigma),
                     dtype=jnp.float32).T                     # (W_in, W_out)

    # Choose the plane-batch so that (a) the grid has >= 2 parallel steps when
    # possible (2 TensorCores on v7x) and (b) double-buffered in+out tiles stay
    # far below the smallest (v7x) VMEM budget.
    target = max_planes_per_step
    if P > 1:
        target = min(target, max(1, P // 2))
    vmem_budget = 8 * 1024 * 1024                              # bytes, conservative
    bytes_per_plane = H * W * max(4, x.dtype.itemsize)
    target = max(1, min(target, vmem_budget // (4 * bytes_per_plane) or 1))
    blk = _largest_divisor(P, target)
    grid = (P // blk,)

    xp = x.reshape(P, H, W)  # free leading-dim merge

    flops = P * (2 * H * W * W + 2 * H * H * W)
    bytes_accessed = 2 * P * H * W * x.dtype.itemsize + (H * H + W * W) * 4

    out = pl.pallas_call(
        _make_blur_kernel(blk),
        out_shape=jax.ShapeDtypeStruct((P, H, W), x.dtype),
        grid=grid,
        in_specs=[
            pl.BlockSpec((blk, H, W), lambda i: (i, 0, 0)),
            pl.BlockSpec((H, H), lambda i: (0, 0)),
            pl.BlockSpec((W, W), lambda i: (0, 0)),
        ],
        out_specs=pl.BlockSpec((blk, H, W), lambda i: (i, 0, 0)),
        compiler_params=pltpu.CompilerParams(
            dimension_semantics=("parallel",),
        ),
        cost_estimate=pl.CostEstimate(
            flops=flops, transcendentals=0, bytes_accessed=bytes_accessed),
    )(xp, bh, bw)

    return out.reshape(N, C, H, W)


if __name__ == "__main__":
    # Module params (deterministic, in-script): kernel_size=5, sigma=1.5
    KERNEL_SIZE = 5
    SIGMA = 1.5

    key = jax.random.PRNGKey(0)
    x = jax.random.uniform(key, (2, 4, 16, 16), dtype=jnp.float32)

    y = gaussian_blur(x, kernel_size=KERNEL_SIZE, sigma=SIGMA)
    jax.block_until_ready(y)

    assert y.shape == x.shape and y.dtype == x.dtype

    # Pure-JAX separable-blur reference (explicit reflect pad + tap sums).
    w1d = jnp.asarray(_gaussian_kernel1d(KERNEL_SIZE, SIGMA), dtype=jnp.float32)
    pad = KERNEL_SIZE // 2
    xp = jnp.pad(x, ((0, 0), (0, 0), (pad, pad), (pad, pad)), mode="reflect")
    H, W = x.shape[2], x.shape[3]
    tmp = sum(w1d[j] * xp[:, :, :, j:j + W] for j in range(KERNEL_SIZE))
    ref = sum(w1d[i] * tmp[:, :, i:i + H, :] for i in range(KERNEL_SIZE))
    assert jnp.allclose(y, ref, atol=2e-3, rtol=2e-3), float(jnp.max(jnp.abs(y - ref)))

    print("KERNEL_OK")
</pallas_src>

<mosaic_0001>
module attributes {stable_mosaic.version = 11 : i64} {
  func.func @kernel(%arg0: i32, %arg1: memref<4x16x16xf32, #tpu.memory_space<vmem>>, %arg2: memref<16x16xf32, #tpu.memory_space<vmem>>, %arg3: memref<16x16xf32, #tpu.memory_space<vmem>>, %arg4: memref<4x16x16xf32, #tpu.memory_space<vmem>>) attributes {dimension_semantics = [#tpu.dimension_semantics<parallel>], iteration_bounds = array<i64: 2>, scalar_prefetch = 0 : i64, scratch_operands = 0 : i64, tpu.core_type = #tpu.core_type<tc>, window_params = [{transform_indices = @transform_0, window_bounds = array<i64: 4, 16, 16>}, {pipeline_mode = #tpu.pipeline_mode<synchronous>, transform_indices = @transform_1, window_bounds = array<i64: 16, 16>}, {pipeline_mode = #tpu.pipeline_mode<synchronous>, transform_indices = @transform_2, window_bounds = array<i64: 16, 16>}, {transform_indices = @transform_3, window_bounds = array<i64: 4, 16, 16>}]} {
    %c0 = arith.constant 0 : index
    %c0_0 = arith.constant 0 : index
    %0 = vector.load %arg2[%c0, %c0_0] : memref<16x16xf32, #tpu.memory_space<vmem>>, vector<16x16xf32>
    %c0_1 = arith.constant 0 : index
    %c0_2 = arith.constant 0 : index
    %1 = vector.load %arg3[%c0_1, %c0_2] : memref<16x16xf32, #tpu.memory_space<vmem>>, vector<16x16xf32>
    %c0_3 = arith.constant 0 : index
    %c0_4 = arith.constant 0 : index
    %c0_5 = arith.constant 0 : index
    %2 = vector.load %arg1[%c0_3, %c0_4, %c0_5] : memref<4x16x16xf32, #tpu.memory_space<vmem>>, vector<1x16x16xf32>
    %3 = vector.shape_cast %2 : vector<1x16x16xf32> to vector<16x16xf32>
    %cst = arith.constant dense<0.000000e+00> : vector<16x16xf32>
    %4 = tpu.matmul %3, %1, %cst {dimension_numbers = #tpu.dot_dimension_numbers<[1], [0], [0], [1], [0, 0, 1, 1], [], []>, precision = #tpu.contract_precision<fp32>} : vector<16x16xf32>, vector<16x16xf32>, vector<16x16xf32> -> vector<16x16xf32>
    %cst_6 = arith.constant dense<0.000000e+00> : vector<16x16xf32>
    %5 = tpu.matmul %0, %4, %cst_6 {dimension_numbers = #tpu.dot_dimension_numbers<[1], [0], [0], [1], [0, 0, 1, 1], [], []>, precision = #tpu.contract_precision<fp32>} : vector<16x16xf32>, vector<16x16xf32>, vector<16x16xf32> -> vector<16x16xf32>
    %c0_7 = arith.constant 0 : index
    %c0_8 = arith.constant 0 : index
    %c0_9 = arith.constant 0 : index
    %6 = vector.load %arg4[%c0_7, %c0_8, %c0_9] : memref<4x16x16xf32, #tpu.memory_space<vmem>>, vector<1x16x16xf32>
    %7 = vector.shape_cast %6 : vector<1x16x16xf32> to vector<16x16xf32>
    %8 = vector.shape_cast %5 : vector<16x16xf32> to vector<1x16x16xf32>
    tpu.vector_store %arg4[%c0_7, %c0_8, %c0_9], %8 {strides = array<i32>} : memref<4x16x16xf32, #tpu.memory_space<vmem>>, vector<1x16x16xf32>,
    %c1 = arith.constant 1 : index
    %c0_10 = arith.constant 0 : index
    %c0_11 = arith.constant 0 : index
    %9 = vector.load %arg1[%c1, %c0_10, %c0_11] : memref<4x16x16xf32, #tpu.memory_space<vmem>>, vector<1x16x16xf32>
    %10 = vector.shape_cast %9 : vector<1x16x16xf32> to vector<16x16xf32>
    %cst_12 = arith.constant dense<0.000000e+00> : vector<16x16xf32>
    %11 = tpu.matmul %10, %1, %cst_12 {dimension_numbers = #tpu.dot_dimension_numbers<[1], [0], [0], [1], [0, 0, 1, 1], [], []>, precision = #tpu.contract_precision<fp32>} : vector<16x16xf32>, vector<16x16xf32>, vector<16x16xf32> -> vector<16x16xf32>
    %cst_13 = arith.constant dense<0.000000e+00> : vector<16x16xf32>
    %12 = tpu.matmul %0, %11, %cst_13 {dimension_numbers = #tpu.dot_dimension_numbers<[1], [0], [0], [1], [0, 0, 1, 1], [], []>, precision = #tpu.contract_precision<fp32>} : vector<16x16xf32>, vector<16x16xf32>, vector<16x16xf32> -> vector<16x16xf32>
    %c1_14 = arith.constant 1 : index
    %c0_15 = arith.constant 0 : index
    %c0_16 = arith.constant 0 : index
    %13 = vector.load %arg4[%c1_14, %c0_15, %c0_16] : memref<4x16x16xf32, #tpu.memory_space<vmem>>, vector<1x16x16xf32>
    %14 = vector.shape_cast %13 : vector<1x16x16xf32> to vector<16x16xf32>
    %15 = vector.shape_cast %12 : vector<16x16xf32> to vector<1x16x16xf32>
    tpu.vector_store %arg4[%c1_14, %c0_15, %c0_16], %15 {strides = array<i32>} : memref<4x16x16xf32, #tpu.memory_space<vmem>>, vector<1x16x16xf32>,
    %c2 = arith.constant 2 : index
    %c0_17 = arith.constant 0 : index
    %c0_18 = arith.constant 0 : index
    %16 = vector.load %arg1[%c2, %c0_17, %c0_18] : memref<4x16x16xf32, #tpu.memory_space<vmem>>, vector<1x16x16xf32>
    %17 = vector.shape_cast %16 : vector<1x16x16xf32> to vector<16x16xf32>
    %cst_19 = arith.constant dense<0.000000e+00> : vector<16x16xf32>
    %18 = tpu.matmul %17, %1, %cst_19 {dimension_numbers = #tpu.dot_dimension_numbers<[1], [0], [0], [1], [0, 0, 1, 1], [], []>, precision = #tpu.contract_precision<fp32>} : vector<16x16xf32>, vector<16x16xf32>, vector<16x16xf32> -> vector<16x16xf32>
    %cst_20 = arith.constant dense<0.000000e+00> : vector<16x16xf32>
    %19 = tpu.matmul %0, %18, %cst_20 {dimension_numbers = #tpu.dot_dimension_numbers<[1], [0], [0], [1], [0, 0, 1, 1], [], []>, precision = #tpu.contract_precision<fp32>} : vector<16x16xf32>, vector<16x16xf32>, vector<16x16xf32> -> vector<16x16xf32>
    %c2_21 = arith.constant 2 : index
    %c0_22 = arith.constant 0 : index
    %c0_23 = arith.constant 0 : index
    %20 = vector.load %arg4[%c2_21, %c0_22, %c0_23] : memref<4x16x16xf32, #tpu.memory_space<vmem>>, vector<1x16x16xf32>
    %21 = vector.shape_cast %20 : vector<1x16x16xf32> to vector<16x16xf32>
    %22 = vector.shape_cast %19 : vector<16x16xf32> to vector<1x16x16xf32>
    tpu.vector_store %arg4[%c2_21, %c0_22, %c0_23], %22 {strides = array<i32>} : memref<4x16x16xf32, #tpu.memory_space<vmem>>, vector<1x16x16xf32>,
    %c3 = arith.constant 3 : index
    %c0_24 = arith.constant 0 : index
    %c0_25 = arith.constant 0 : index
    %23 = vector.load %arg1[%c3, %c0_24, %c0_25] : memref<4x16x16xf32, #tpu.memory_space<vmem>>, vector<1x16x16xf32>
    %24 = vector.shape_cast %23 : vector<1x16x16xf32> to vector<16x16xf32>
    %cst_26 = arith.constant dense<0.000000e+00> : vector<16x16xf32>
    %25 = tpu.matmul %24, %1, %cst_26 {dimension_numbers = #tpu.dot_dimension_numbers<[1], [0], [0], [1], [0, 0, 1, 1], [], []>, precision = #tpu.contract_precision<fp32>} : vector<16x16xf32>, vector<16x16xf32>, vector<16x16xf32> -> vector<16x16xf32>
    %cst_27 = arith.constant dense<0.000000e+00> : vector<16x16xf32>
    %26 = tpu.matmul %0, %25, %cst_27 {dimension_numbers = #tpu.dot_dimension_numbers<[1], [0], [0], [1], [0, 0, 1, 1], [], []>, precision = #tpu.contract_precision<fp32>} : vector<16x16xf32>, vector<16x16xf32>, vector<16x16xf32> -> vector<16x16xf32>
    %c3_28 = arith.constant 3 : index
    %c0_29 = arith.constant 0 : index
    %c0_30 = arith.constant 0 : index
    %27 = vector.load %arg4[%c3_28, %c0_29, %c0_30] : memref<4x16x16xf32, #tpu.memory_space<vmem>>, vector<1x16x16xf32>
    %28 = vector.shape_cast %27 : vector<1x16x16xf32> to vector<16x16xf32>
    %29 = vector.shape_cast %26 : vector<16x16xf32> to vector<1x16x16xf32>
    tpu.vector_store %arg4[%c3_28, %c0_29, %c0_30], %29 {strides = array<i32>} : memref<4x16x16xf32, #tpu.memory_space<vmem>>, vector<1x16x16xf32>,
    return
  }
  func.func @transform_0(%arg0: i32) -> (i32, i32, i32) {
    %c0_i32 = arith.constant 0 : i32
    %c0_i32_0 = arith.constant 0 : i32
    %c0_i32_1 = arith.constant 0 : i32
    return %arg0, %c0_i32, %c0_i32_0 : i32, i32, i32
  }
  func.func @transform_1(%arg0: i32) -> (i32, i32) {
    %c0_i32 = arith.constant 0 : i32
    %c0_i32_0 = arith.constant 0 : i32
    %c0_i32_1 = arith.constant 0 : i32
    return %c0_i32, %c0_i32_0 : i32, i32
  }
  func.func @transform_2(%arg0: i32) -> (i32, i32) {
    %c0_i32 = arith.constant 0 : i32
    %c0_i32_0 = arith.constant 0 : i32
    %c0_i32_1 = arith.constant 0 : i32
    return %c0_i32, %c0_i32_0 : i32, i32
  }
  func.func @transform_3(%arg0: i32) -> (i32, i32, i32) {
    %c0_i32 = arith.constant 0 : i32
    %c0_i32_0 = arith.constant 0 : i32
    %c0_i32_1 = arith.constant 0 : i32
    return %arg0, %c0_i32, %c0_i32_0 : i32, i32, i32
  }
}

</mosaic_0001>

<bundles_post_ra>
// kernel: tpu_custom_call.1
= control target key start
LH: loop header
LB: loop body
LE: loop exit
PB: predicated region body
PF: predicated region fallthrough
CT: control target
= control target key end

     0   :  { %8 = vsyncpa [#allocation3], 0  ;;  %s5897_s0 = inlined_call_operand.hbm [shape: f32[8,16,16], index: 0, kind: input, shape index: {}]   ;;  %s5898_s1 = inlined_call_operand.hbm [shape: f32[16,16], index: 1, kind: input, shape index: {}]   ;;  %s5899_s2 = inlined_call_operand.hbm [shape: f32[16,16], index: 2, kind: input, shape index: {}]   ;;  %s5900_s3 = inlined_call_operand.hbm [shape: f32[8,16,16], index: 3, kind: output, shape index: {}]  }
   0x1   :  { %10 = vsyncpa [#allocation3 + $0x1], 0 }
   0x2   :  { %11 = vsyncpa [#allocation6], 0 }
   0x3   :  { %12 = vsyncpa [#allocation4], 0 }
   0x4   :  { %14 = vsyncpa [#allocation4 + $0x1], 0  ;;  %s5494_s12 = smov 0   ;;  %s5496_s13 = smov 0  }
   0x5   :  { %s5498_s14 = smov 0   ;;  %s5500_s15 = smov 0  }
   0x6 LB: > { %s5515_s16 = sadd.s32 4294967295, %s5464_s15   ;;  %s4401_s17 = sadd.s32 4294967294, %s5464_s15   ;;  %s5464_s15 = sphi %s5500_s15, %s5920_s15   ;;  %s5460_s14 = sphi %s5498_s14, %s5919_s14   ;;  %s5456_s13 = sphi %s5496_s13, %s5918_s13   ;;  %s5452_s12 = sphi %s5494_s12, %s5917_s12  }
   0x7   : > { %p40_p0 = scmp.ne.s32.totalorder %s5456_s13, %s5452_s12  ;;  %p5901_p1 = scmp.eq.s32.totalorder %s5515_s16, 0 }
   0x8   : > { %p112_p3 = scmp.eq.s32.totalorder %s4401_s17, 1  ;;  %p4402_p5 = scmp.ge.s32.totalorder %s5464_s15, 1 }
   0x9   : > { %p5524_p4 = por %p5901_p1, %p40_p0  ;;  %p119_p7 = scmp.lt.s32.totalorder %s5464_s15, 3 }
   0xa   : > { %p5529_p6 = por %p112_p3, %p40_p0  ;;  %s5466_s21 = smov [#allocation5]  }
   0xb   : > { %s5904_s18 = scalar_select %p5524_p4, 1, 0 }
   0xc   : > { %s5905_s19 = scalar_select %p5529_p6, 1, 0 }
   0xd   : > { %p5534_p8 = pnand %p4402_p5, %p119_p7  ;;  %s131_s22 = sshll.u32 %s5466_s21, 4  ;;  %s5538_s22 = int_to_ptr.vmem [resolvable:$true] %s131_s22 }
   0xe   : > { %s5467_s24 = smov [#allocation7]   ;;  %s5308_s28 = scalar_lea.hbm %s5898_s1, 256 }
   0xf   : > { %p5249_p9 = pneg %p5534_p8  ;;  %s144_s25 = sshll.u32 %s5467_s24, 4  ;;  %s5549_s25 = int_to_ptr.vmem [resolvable:$true] %s144_s25 }
  0x10   : > { %p5309_p12 = scmp.ne.s32.totalorder %s5898_s1, %s5308_s28  ;;  %p5315_p5 = scmp.lt.u32.totalorder %s5308_s28, %s5898_s1 }
  0x11   : > { %p5545_p11 = pnand %p5249_p9, %p5901_p1 }
  0x13   : > { %p5310_p13 = pneg %p5545_p11 }
  0x15   : > { %p5311_p0 = pnand %p5310_p13, %p5309_p12 }
  0x17   : > { %p5312_p3 = pneg %p5311_p0 }
  0x19   : > { %p5317_p7 = pnand %p5315_p5, %p5312_p3 }
  0x1b   : > { %5320 = shalt.err (!%p5317_p7)
}
  0x1c   : > { %s5321_s6 = scalar_lea.vmem %s5538_s22, 256  ;;  %p5329_p2 = scmp.lt.s32.totalorder %s5538_s22, %s5538_s22 }
  0x1d   : > { %p5322_p9 = scmp.ne.s32.totalorder %s5538_s22, %s5321_s6  ;;  %p5330_p12 = scmp.lt.s32.totalorder %s5321_s6, %s5321_s6 }
  0x1f   : > { %p5324_p10 = pnand %p5322_p9, %p5310_p13  ;;  %p5331_p0 = por %p5330_p12, %p5329_p2 }
  0x21   : > { %p5325_p1 = pneg %p5324_p10 }
  0x23   : > { %p5332_p6 = pnand %p5331_p0, %p5325_p1 }
  0x25   : > { %5335 = shalt.err (!%p5332_p6)
}
  0x26   : > { %s5468_s7 = smov 128   ;;  %s5469_s8 = smov 8  }
  0x27   : > { %5252 = dma.hbm_to_vmem [thread:$0]  (!%p5545_p11), %s5898_s1, 256, %s5538_s22, [#allocation6], %s5468_s7, %s5468_s7, %s5469_s8  }
  0x28   : > { %s5336_s21 = scalar_lea.hbm %s5899_s2, 256 }
  0x29   : > { %p5337_p1 = scmp.ne.s32.totalorder %s5899_s2, %s5336_s21  ;;  %p5343_p10 = scmp.lt.u32.totalorder %s5336_s21, %s5899_s2 }
  0x2b   : > { %p5339_p2 = pnand %p5337_p1, %p5310_p13 }
  0x2d   : > { %p5340_p6 = pneg %p5339_p2 }
  0x2f   : > { %p5345_p3 = pnand %p5343_p10, %p5340_p6 }
  0x31   : > { %5348 = shalt.err (!%p5345_p3)
}
  0x32   : > { %s5349_s22 = scalar_lea.vmem %s5549_s25, 256  ;;  %p5357_p12 = scmp.lt.s32.totalorder %s5549_s25, %s5549_s25 }
  0x33   : > { %p5350_p5 = scmp.ne.s32.totalorder %s5549_s25, %s5349_s22  ;;  %p5358_p0 = scmp.lt.s32.totalorder %s5349_s22, %s5349_s22 }
  0x35   : > { %p5352_p7 = pnand %p5350_p5, %p5310_p13  ;;  %p5359_p1 = por %p5358_p0, %p5357_p12 }
  0x37   : > { %p5353_p9 = pneg %p5352_p7 }
  0x39   : > { %p5360_p2 = pnand %p5359_p1, %p5353_p9 }
  0x3b   : > { %5363 = shalt.err (!%p5360_p2)
}
  0x3c   : > { %5255 = dma.hbm_to_vmem [thread:$0]  (!%p5545_p11), %s5899_s2, 256, %s5549_s25, [#allocation6], %s5468_s7, %s5468_s7, %s5469_s8  }
  0x3d   : > { %s5610_s23 = sadd.s32 1, %s5464_s15   ;;  %s27_s4 = sadd.s32 1, %s5460_s14 }
  0x3e   : > { %s24_s5 = ssub.s32 %s5464_s15, %s5610_s23  ;;  %p34_p13 = scmp.ne.s32.totalorder %s5460_s14, %s5456_s13 }
  0x3f   : > { %p25_p6 = scmp.eq.s32.totalorder %s24_s5, 0  ;;  %p35_p10 = scmp.eq.s32.totalorder %s5464_s15, 0 }
  0x40   : > { %p5908_p3 = scmp.eq.s32.totalorder %s5515_s16, 1  ;;  %p5266_p7 = scmp.lt.s32.totalorder %s5464_s15, 2 }
  0x41   : > { %s5626_s9 = scalar_select %p25_p6, %s5460_s14, %s27_s4  }
  0x42   : > { %p5620_p5 = por %p5908_p3, %p34_p13  ;;  %p36_p9 = por %p35_p10, %p34_p13 }
  0x43   : > { %s158_s10 = sand.u32 1, %s5460_s14   ;;  %s4434_s25 = sshll.u32 %s5464_s15, 10 }
  0x44   : > { %s5909_s6 = scalar_select %p5620_p5, 1, 0 }
  0x45   : > { %s4406_s11 = sshll.u32 %s158_s10, 6  ;;  %s5633_s24 = scalar_lea.hbm %s5897_s0, %s4434_s25 }
  0x46   : > { %s162_s26 = scalar_lea.vmem [#allocation2], %s4406_s11  ;;  %p5637_p11 = pnand %p5266_p7, %p36_p9 }
  0x47   : > { %s170_s27 = sshll.u32 %s162_s26, 4  ;;  %s5641_s22 = scalar_lea.sflag [#allocation3], %s158_s10  ;;  %s5635_s27 = int_to_ptr.vmem [resolvable:$true] %s170_s27 }
  0x48   : > { %s5364_s29 = scalar_lea.hbm %s5633_s24, 1024  ;;  %p5366_p0 = pneg %p5637_p11 }
  0x49   : > { %p5365_p12 = scmp.ne.s32.totalorder %s5633_s24, %s5364_s29  ;;  %s5369_s5 = scalar_lea.hbm %s5897_s0, 2048 }
  0x4a   : > { %p5370_p13 = scmp.lt.u32.totalorder %s5633_s24, %s5897_s0  ;;  %p5371_p6 = scmp.lt.u32.totalorder %s5369_s5, %s5364_s29 }
  0x4b   : > { %p5367_p1 = pnand %p5366_p0, %p5365_p12  ;;  %p5373_p3 = scmp.lt.u32.totalorder %s5364_s29, %s5633_s24 }
  0x4c   : > { %p5372_p10 = por %p5371_p6, %p5370_p13 }
  0x4d   : > { %p5368_p2 = pneg %p5367_p1 }
  0x4e   : > { %p5374_p7 = por %p5373_p3, %p5372_p10 }
  0x50   : > { %p5375_p9 = pnand %p5374_p7, %p5368_p2 }
  0x52   : > { %5378 = shalt.err (!%p5375_p9)
}
  0x53   : > { %s5379_s10 = scalar_lea.vmem %s5635_s27, 1024  ;;  %s5470_s17 = smov [#allocation2]  }
  0x54   : > { %p5380_p12 = scmp.ne.s32.totalorder %s5635_s27, %s5379_s10  ;;  %s5384_s21 = sshll.u32 %s5470_s17, 4  ;;  %s5385_s21 = int_to_ptr.vmem [resolvable:$false] %s5384_s21 }
  0x55   : > { %s5386_s26 = scalar_lea.vmem %s5385_s21, 2048  ;;  %p5387_p4 = scmp.lt.s32.totalorder %s5635_s27, %s5385_s21 }
  0x56   : > { %p5382_p1 = pnand %p5380_p12, %p5366_p0  ;;  %p5388_p13 = scmp.lt.s32.totalorder %s5386_s26, %s5379_s10 }
  0x58   : > { %p5383_p5 = pneg %p5382_p1  ;;  %p5389_p6 = por %p5388_p13, %p5387_p4 }
  0x5a   : > { %p5390_p10 = pnand %p5389_p6, %p5383_p5 }
  0x5c   : > { %5393 = shalt.err (!%p5390_p10)
}
  0x5d   : > { %5259 = dma.hbm_to_vmem [thread:$0]  (!%p5637_p11), %s5633_s24, 1024, %s5635_s27, %s5641_s22, %s5468_s7, %s5468_s7, %s5469_s8  }
  0x5e   : > { %182 = sbr.rel (%p5534_p8) target bundleno = 779 (0x30b), region = 32  ;;  %s5675_s29 = sand.u32 (!%p5534_p8), 1, %s5456_s13  }
  0x5f   : > { %s4411_s30 = sshll.u32 (!%p5534_p8), %s5675_s29, 6  ;;  %s185_s4 = scalar_lea.sflag (!%p5534_p8), [#allocation3], %s5675_s29 }
  0x60   : > { %s5681_s28 = scalar_lea.vmem (!%p5534_p8), [#allocation2], %s4411_s30  ;;  %p5911_p4 = scmp.ne.s32.totalorder (!%p5534_p8), %s5904_s18, 0 }
  0x65   : > { %5439 = dma.done.wait (%p5911_p4), %s185_s4, 1024  }
  0x66   : > { %5441 = vsyncadd (%p5911_p4), %s185_s4, 4294966272  ;;  %p5912_p5 = scmp.eq.s32.totalorder %s5515_s16, 0 }
  0x68   : > { %5443 = dma.done.wait (%p5912_p5), [#allocation6], 512   ;;  %p5913_p8 = pmov %p5912_p5 }
  0x69   : > { %vm227_vm0 = vcmask 130048   ;;  %v223_v0 = vld [vmem:[#allocation7] sm:$0xff]  ;;  %v224_v1 = vld [vmem:[#allocation7 + $0x8] sm:$0xff]  ;;  %v225_v2 = vld [vmem:[%s5681_s28] sm:$0xff]  ;;  %s218_s18 = scalar_lea.vmem [#allocation8], %s4411_s30  ;;  %s4436_s7 = sshll.u32 %s5515_s16, 10 }
  0x6a   : > { %5445 = vsyncadd (%p5913_p8), [#allocation6], 4294966784  ;;  %v235_v3 = vand.u32 4294901760, %v223_v0  ;;  %v238_v4 = vand.u32 4294901760, %v224_v1  ;;  %v229_v5 = vsel %vm227_vm0, %v225_v2, 0  ;;  %v226_v6 = vld [vmem:[%s5681_s28 + $0x8] sm:$0xff]  ;;  %s5851_s27 = scalar_lea.hbm %s5900_s3, %s4436_s7 }
  0x6b   : > { %v301_v7 = vand.u32 4294901760, %v229_v5  ;;  %v232_v8 = vsel %vm227_vm0, %v226_v6, 0  ;;  %v4415_v30 = vld [vmem:[%s5681_s28 + $0x10] sm:$0xff]  ;;  %v4416_v32 = vld [vmem:[%s5681_s28 + $0x18] sm:$0xff]  ;;  %v4419_v44 = vld [vmem:[%s5681_s28 + $0x20] sm:$0xff]  ;;  %s4309_s20 = sshll.u32 %s218_s18, 4  ;;  %s5846_s20 = int_to_ptr.vmem [resolvable:$true] %s4309_s20 }
  0x6c   : > { %v5695_v9 = vpack.c.bf16 %v238_v4, %v235_v3  ;;  %v311_v10 = vand.u32 4294901760, %v232_v8  ;;  %v323_v11 = vsub.f32 %v223_v0, %v235_v3  ;;  %v330_v12 = vsub.f32 %v224_v1, %v238_v4  ;;  %v4420_v46 = vld [vmem:[%s5681_s28 + $0x28] sm:$0xff]  ;;  %v4423_v58 = vld [vmem:[%s5681_s28 + $0x30] sm:$0xff]  ;;  %v4424_v60 = vld [vmem:[%s5681_s28 + $0x38] sm:$0xff]  ;;  %s4295_s22 = scalar_lea.sflag [#allocation4], %s5675_s29  ;;  %s5394_s5 = scalar_lea.vmem %s5846_s20, 1024 }
  0x6d   : > { %v302_v13 = vsub.f32 %v229_v5, %v301_v7  ;;  %v1250_v31 = vsel %vm227_vm0, %v4415_v30, 0  ;;  %v1253_v34 = vsel %vm227_vm0, %v4416_v32, 0  ;;  %v2266_v45 = vsel %vm227_vm0, %v4419_v44, 0  ;;  %v221_v4 = vld [vmem:[#allocation5] sm:$0xff]  ;;  %p5395_p11 = scmp.ne.s32.totalorder %s5846_s20, %s5394_s5  ;;  %p5914_p0 = scmp.ne.s32.totalorder %s5909_s6, 0 }
  0x6e   : > { %4966 = vmatprep.subr.bf16.mxu0 %v5695_v9  ;;  %v312_v14 = vsub.f32 %v232_v8, %v311_v10  ;;  %v324_v15 = vand.u32 4294901760, %v323_v11  ;;  %v331_v16 = vand.u32 4294901760, %v330_v12  ;;  %v5701_v28 = vpack.c.bf16 %v330_v12, %v323_v11  ;;  %s5471_s16 = smov [#allocation8]  }
  0x6f   : > { %4968 = vmatpush3.bf16.msra.mxu0 %v5695_v9  ;;  %v303_v17 = vand.u32 4294901760, %v302_v13  ;;  %v1322_v33 = vand.u32 4294901760, %v1250_v31  ;;  %v1332_v35 = vand.u32 4294901760, %v1253_v34  ;;  %v2338_v47 = vand.u32 4294901760, %v2266_v45  ;;  %p5396_p2 = pnand %p5395_p11, %p5914_p0  ;;  %s5398_s11 = sshll.u32 %s5471_s16, 4  ;;  %s5399_s11 = int_to_ptr.vmem [resolvable:$false] %s5398_s11 }
  0x70   : > { %v313_v18 = vand.u32 4294901760, %v312_v14  ;;  %v325_v19 = vsub.f32 %v323_v11, %v324_v15  ;;  %v332_v20 = vsub.f32 %v330_v12, %v331_v16  ;;  %v5708_v29 = vpack.c.bf16 %v331_v16, %v324_v15  ;;  %v222_v16 = vld [vmem:[#allocation5 + $0x8] sm:$0xff]  ;;  %s5400_s25 = scalar_lea.vmem %s5399_s11, 2048  ;;  %p5401_p7 = scmp.lt.s32.totalorder %s5846_s20, %s5399_s11 }
  0x71   : > { %v304_v21 = vsub.f32 %v302_v13, %v303_v17  ;;  %v1323_v36 = vsub.f32 %v1250_v31, %v1322_v33  ;;  %v1333_v37 = vsub.f32 %v1253_v34, %v1332_v35  ;;  %v2269_v48 = vsel %vm227_vm0, %v4420_v46, 0  ;;  %p5397_p3 = pneg %p5396_p2  ;;  %p5402_p9 = scmp.lt.s32.totalorder %s5400_s25, %s5394_s5 }
  0x72   : > { %v314_v22 = vsub.f32 %v312_v14, %v313_v18  ;;  %v326_v23 = vand.u32 4294901760, %v325_v19  ;;  %v333_v24 = vand.u32 4294901760, %v332_v20  ;;  %v2348_v49 = vand.u32 4294901760, %v2269_v48 }
  0x73   : > { %v305_v25 = vand.u32 4294901760, %v304_v21  ;;  %v1324_v38 = vand.u32 4294901760, %v1323_v36  ;;  %v1334_v39 = vand.u32 4294901760, %v1333_v37  ;;  %v2339_v50 = vsub.f32 %v2266_v45, %v2338_v47  ;;  %p5403_p12 = por %p5402_p9, %p5401_p7 }
  0x74   : > { %v315_v26 = vand.u32 4294901760, %v314_v22  ;;  %v5699_v27 = vpack.c.bf16 %v333_v24, %v326_v23  ;;  %v2349_v51 = vsub.f32 %v2269_v48, %v2348_v49  ;;  %v3282_v59 = vsel %vm227_vm0, %v4423_v58, 0 }
  0x75   : > { %4633 = vmatprep.mubr.f32.mxu0 %v305_v25  ;;  %v1325_v40 = vsub.f32 %v1323_v36, %v1324_v38  ;;  %v1335_v41 = vsub.f32 %v1333_v37, %v1334_v39  ;;  %v2340_v52 = vand.u32 4294901760, %v2339_v50  ;;  %v3354_v61 = vand.u32 4294901760, %v3282_v59  ;;  %p5404_p1 = pnand %p5403_p12, %p5397_p3 }
  0x76   : > { %4634 = vmatmul.mubr.f32.vlgmr.msra.gmra.mrb[0].mxu0 %v315_v26  ;;  %4970 = vmatprep.subr.bf16.mxu0 %v5699_v27  ;;  %v2350_v53 = vand.u32 4294901760, %v2349_v51  ;;  %v3285_v62 = vsel %vm227_vm0, %v4424_v60, 0  ;;  %v737_v6 = vsel %vm227_vm0, %v221_v4, 0 }
  0x77   : > { %4972 = vmatpush3.bf16.msra.mxu0 %v5699_v27  ;;  %4640 = vmatprep.mubr.f32.mxu0 %v301_v7  ;;  %v1326_v42 = vand.u32 4294901760, %v1325_v40  ;;  %v1336_v43 = vand.u32 4294901760, %v1335_v41  ;;  %v2341_v54 = vsub.f32 %v2339_v50, %v2340_v52  ;;  %v3364_v63 = vand.u32 4294901760, %v3285_v62 }
  0x78   : > { %4974 = vmatprep.subr.bf16.mxu0 %v5701_v28  ;;  %v2351_v55 = vsub.f32 %v2349_v51, %v2350_v53  ;;  %v3355_v0 = vsub.f32 %v3282_v59, %v3354_v61 }
  0x79   : > { %v2342_v56 = vand.u32 4294901760, %v2341_v54  ;;  %v3365_v1 = vsub.f32 %v3285_v62, %v3364_v63 }
  0x7a   : > { %v2352_v57 = vand.u32 4294901760, %v2351_v55  ;;  %v3356_v2 = vand.u32 4294901760, %v3355_v0 }
  0x7b   : > { %v3366_v3 = vand.u32 4294901760, %v3365_v1 }
  0x7c   : > { %v3357_v5 = vsub.f32 %v3355_v0, %v3356_v2 }
  0x7d   : > { %v3367_v8 = vsub.f32 %v3365_v1, %v3366_v3 }
  0x7e   : > { %4641 = vmatmul.mubr.f32.vlgmr.msra.gmra.mrb[0].mxu0 %v311_v10  ;;  %v3358_v11 = vand.u32 4294901760, %v3357_v5 }
  0x7f   : > { %4976 = vmatpush3.bf16.msra.mxu0 %v5701_v28  ;;  %4647 = vmatprep.mubr.f32.mxu0 %v302_v13  ;;  %v3368_v13 = vand.u32 4294901760, %v3367_v8 }
  0x80   : > { %4978 = vmatprep.subr.bf16.mxu0 %v5695_v9 }
  0x86   : > { %4648 = vmatmul.mubr.f32.vlgmr.msra.gmra.mrb[0].mxu0 %v312_v14 }
  0x87   : > { %4980 = vmatpush3.bf16.msra.mxu0 %v5695_v9  ;;  %4654 = vmatprep.mubr.f32.mxu0 %v303_v17  ;;  %v740_v17 = vsel %vm227_vm0, %v222_v16, 0 }
  0x88   : > { %4982 = vmatprep.subr.bf16.mxu0 %v5708_v29 }
  0x8e   : > { %4655 = vmatmul.mubr.f32.vlgmr.msra.gmra.mrb[0].mxu0 %v313_v18  ;;  %v5778_v18 = vand.u32 4294901760, %v740_v17 }
  0x8f   : > { %4984 = vmatpush3.bf16.msra.mxu0 %v5708_v29  ;;  %4661 = vmatprep.mubr.f32.mxu0 %v301_v7 }
  0x90   : > { %4986 = vmatprep.subr.bf16.mxu0 %v5695_v9  ;;  %v5781_v19 = vsub.f32 %v740_v17, %v5778_v18 }
  0x92   : > { %v5784_v20 = vand.u32 4294901760, %v5781_v19 }
  0x96   : > { %4662 = vmatmul.mubr.f32.vlgmr.msra.gmra.mrb[0].mxu0 %v311_v10 }
  0x97   : > { %4988 = vmatpush3.bf16.msra.mxu0 %v5695_v9  ;;  %4668 = vmatprep.mubr.f32.mxu0 %v301_v7  ;;  %v5753_v7 = vand.u32 4294901760, %v737_v6 }
  0x98   : > { %5014 = vmatprep.subr.bf16.mxu0 %v5695_v9 }
  0x9e   : > { %4669 = vmatmul.mubr.f32.vlgmr.msra.gmra.mrb[0].mxu0 %v311_v10  ;;  %v5756_v10 = vsub.f32 %v737_v6, %v5753_v7 }
  0x9f   : > { %5016 = vmatpush3.bf16.msra.mxu0 %v5695_v9  ;;  %4717 = vmatprep.mubr.f32.mxu0 %v1326_v42 }
  0xa0   : > { %5018 = vmatprep.subr.bf16.mxu0 %v5699_v27  ;;  %v5759_v12 = vand.u32 4294901760, %v5756_v10 }
  0xa2   : > { %4718 = vmatmul.mubr.f32.vlgmr.msra.gmra.mrb[2].mxu0 %v1336_v43  ;;  %v812_v14 = vsub.f32 %v5756_v10, %v5759_v12 }
  0xa3   : > { %5020 = vmatpush3.bf16.msra.mxu0 %v5699_v27  ;;  %4724 = vmatprep.mubr.f32.mxu0 %v1322_v33 }
  0xa4   : > { %5022 = vmatprep.subr.bf16.mxu0 %v5701_v28  ;;  %v5765_v15 = vand.u32 4294901760, %v812_v14 }
  0xa6   : > { %4675 = vmatprep.mubr.f32.mxu1 %v5765_v15 }
  0xaa   : > { %4725 = vmatmul.mubr.f32.vlgmr.msra.gmra.mrb[2].mxu0 %v1332_v35 }
  0xab   : > { %5024 = vmatpush3.bf16.msra.mxu0 %v5701_v28  ;;  %4731 = vmatprep.mubr.f32.mxu0 %v1323_v36 }
  0xac   : > { %5026 = vmatprep.subr.bf16.mxu0 %v5695_v9 }
  0xb2   : > { %4732 = vmatmul.mubr.f32.vlgmr.msra.gmra.mrb[2].mxu0 %v1333_v37 }
  0xb3   : > { %5028 = vmatpush3.bf16.msra.mxu0 %v5695_v9  ;;  %4738 = vmatprep.mubr.f32.mxu0 %v1324_v38 }
  0xb4   : > { %5030 = vmatprep.subr.bf16.mxu0 %v5708_v29 }
  0xba   : > { %4739 = vmatmul.mubr.f32.vlgmr.msra.gmra.mrb[2].mxu0 %v1334_v39 }
  0xbb   : > { %5032 = vmatpush3.bf16.msra.mxu0 %v5708_v29  ;;  %4745 = vmatprep.mubr.f32.mxu0 %v1322_v33 }
  0xbc   : > { %5034 = vmatprep.subr.bf16.mxu0 %v5695_v9 }
  0xc2   : > { %4746 = vmatmul.mubr.f32.vlgmr.msra.gmra.mrb[2].mxu0 %v1332_v35 }
  0xc3   : > { %5036 = vmatpush3.bf16.msra.mxu0 %v5695_v9  ;;  %4752 = vmatprep.mubr.f32.mxu0 %v1322_v33 }
  0xc4   : > { %5062 = vmatprep.subr.bf16.mxu0 %v5695_v9 }
  0xca   : > { %4753 = vmatmul.mubr.f32.vlgmr.msra.gmra.mrb[2].mxu0 %v1332_v35 }
  0xcb   : > { %5064 = vmatpush3.bf16.msra.mxu0 %v5695_v9  ;;  %4801 = vmatprep.mubr.f32.mxu0 %v2342_v56 }
  0xcc   : > { %5066 = vmatprep.subr.bf16.mxu0 %v5699_v27 }
  0xce   : > { %4802 = vmatmul.mubr.f32.vlgmr.msra.gmra.mrb[4].mxu0 %v2352_v57 }
  0xcf   : > { %5068 = vmatpush3.bf16.msra.mxu0 %v5699_v27  ;;  %4808 = vmatprep.mubr.f32.mxu0 %v2338_v47 }
  0xd0   : > { %5070 = vmatprep.subr.bf16.mxu0 %v5701_v28 }
  0xd6   : > { %4809 = vmatmul.mubr.f32.vlgmr.msra.gmra.mrb[4].mxu0 %v2348_v49 }
  0xd7   : > { %5072 = vmatpush3.bf16.msra.mxu0 %v5701_v28  ;;  %4815 = vmatprep.mubr.f32.mxu0 %v2339_v50 }
  0xd8   : > { %5074 = vmatprep.subr.bf16.mxu0 %v5695_v9 }
  0xde   : > { %4816 = vmatmul.mubr.f32.vlgmr.msra.gmra.mrb[4].mxu0 %v2349_v51 }
  0xdf   : > { %5076 = vmatpush3.bf16.msra.mxu0 %v5695_v9  ;;  %4822 = vmatprep.mubr.f32.mxu0 %v2340_v52 }
  0xe0   : > { %5078 = vmatprep.subr.bf16.mxu0 %v5708_v29 }
  0xe6   : > { %4823 = vmatmul.mubr.f32.vlgmr.msra.gmra.mrb[4].mxu0 %v2350_v53 }
  0xe7   : > { %5080 = vmatpush3.bf16.msra.mxu0 %v5708_v29  ;;  %4829 = vmatprep.mubr.f32.mxu0 %v2338_v47 }
  0xe8   : > { %5082 = vmatprep.subr.bf16.mxu0 %v5695_v9 }
  0xee   : > { %4830 = vmatmul.mubr.f32.vlgmr.msra.gmra.mrb[4].mxu0 %v2348_v49 }
  0xef   : > { %5084 = vmatpush3.bf16.msra.mxu0 %v5695_v9  ;;  %4836 = vmatprep.mubr.f32.mxu0 %v2338_v47 }
  0xf0   : > { %5110 = vmatprep.subr.bf16.mxu0 %v5695_v9 }
  0xf6   : > { %4837 = vmatmul.mubr.f32.vlgmr.msra.gmra.mrb[4].mxu0 %v2348_v49 }
  0xf7   : > { %5112 = vmatpush3.bf16.msra.mxu0 %v5695_v9  ;;  %4885 = vmatprep.mubr.f32.mxu0 %v3358_v11 }
  0xf8   : > { %5114 = vmatprep.subr.bf16.mxu0 %v5699_v27 }
  0xfa   : > { %4886 = vmatmul.mubr.f32.vlgmr.msra.gmra.mrb[6].mxu0 %v3368_v13 }
  0xfb   : > { %5116 = vmatpush3.bf16.msra.mxu0 %v5699_v27  ;;  %4892 = vmatprep.mubr.f32.mxu0 %v3354_v61 }
  0xfc   : > { %5118 = vmatprep.subr.bf16.mxu0 %v5701_v28 }
 0x102   : > { %4893 = vmatmul.mubr.f32.vlgmr.msra.gmra.mrb[6].mxu0 %v3364_v63 }
 0x103   : > { %5120 = vmatpush3.bf16.msra.mxu0 %v5701_v28  ;;  %4899 = vmatprep.mubr.f32.mxu0 %v3355_v0 }
 0x104   : > { %5122 = vmatprep.subr.bf16.mxu0 %v5695_v9 }
 0x10a   : > { %4900 = vmatmul.mubr.f32.vlgmr.msra.gmra.mrb[6].mxu0 %v3365_v1 }
 0x10b   : > { %5124 = vmatpush3.bf16.msra.mxu0 %v5695_v9  ;;  %4906 = vmatprep.mubr.f32.mxu0 %v3356_v2 }
 0x10c   : > { %5126 = vmatprep.subr.bf16.mxu0 %v5708_v29 }
 0x112   : > { %4907 = vmatmul.mubr.f32.vlgmr.msra.gmra.mrb[6].mxu0 %v3366_v3 }
 0x113   : > { %5128 = vmatpush3.bf16.msra.mxu0 %v5708_v29  ;;  %4913 = vmatprep.mubr.f32.mxu0 %v3354_v61 }
 0x114   : > { %5130 = vmatprep.subr.bf16.mxu0 %v5695_v9 }
 0x11a   : > { %4914 = vmatmul.mubr.f32.vlgmr.msra.gmra.mrb[6].mxu0 %v3364_v63 }
 0x11b   : > { %5132 = vmatpush3.bf16.msra.mxu0 %v5695_v9  ;;  %4920 = vmatprep.mubr.f32.mxu0 %v3354_v61  ;;  %v822_v9 = vsub.f32 %v5781_v19, %v5784_v20 }
 0x11d   : > { %v5788_v30 = vand.u32 4294901760, %v822_v9 }
 0x122   : > { %4921 = vmatmul.mubr.f32.vlgmr.msra.gmra.mrb[6].mxu0 %v3364_v63 }
 0x171   : > { %v4670_v21 = vpop.f32.mrb[0].mxu0 }
 0x172   : > { %v746_v22 = vand.u32 4294901760, %v4670_v21  ;;  %v726_v23 = vpop.f32.mrb[1].mxu0 }
 0x173   : > { %v743_v24 = vand.u32 4294901760, %v726_v23 }
 0x174   : > { %v838_v25 = vsub.f32 %v4670_v21, %v746_v22 }
 0x175   : > { %v4989_v26 = vpack.c.bf16 %v746_v22, %v743_v24  ;;  %v831_v27 = vsub.f32 %v726_v23, %v743_v24 }
 0x176   : > { %v839_v28 = vand.u32 4294901760, %v838_v25 }
 0x177   : > { %v832_v29 = vand.u32 4294901760, %v831_v27  ;;  %4990 = vmatprep.subr.bf16.mxu1 %v4989_v26  ;;  %v4997_v31 = vpack.c.bf16 %v838_v25, %v831_v27 }
 0x178   : > { %v840_v32 = vsub.f32 %v838_v25, %v839_v28  ;;  %4992 = vmatpush3.bf16.msra.mxu1 %v4989_v26 }
 0x179   : > { %v833_v33 = vsub.f32 %v831_v27, %v832_v29  ;;  %v5005_v34 = vpack.c.bf16 %v839_v28, %v832_v29 }
 0x17a   : > { %v841_v35 = vand.u32 4294901760, %v840_v32 }
 0x17b   : > { %4676 = vmatmul.mubr.f32.vlgmr.msra.gmra.mrb[0].mxu1 %v5788_v30  ;;  %v834_v36 = vand.u32 4294901760, %v833_v33 }
 0x17c   : > { %4682 = vmatprep.mubr.f32.mxu1 %v5753_v7 }
 0x17d   : > { %v4993_v37 = vpack.c.bf16 %v841_v35, %v834_v36 }
 0x17f   : > { %4994 = vmatprep.subr.bf16.mxu1 %v4993_v37 }
 0x180   : > { %4996 = vmatpush3.bf16.msra.mxu1 %v4993_v37 }
 0x181   : > { %4998 = vmatprep.subr.bf16.mxu1 %v4997_v31 }
 0x183   : > { %4683 = vmatmul.mubr.f32.vlgmr.msra.gmra.mrb[0].mxu1 %v5778_v18 }
 0x184   : > { %5000 = vmatpush3.bf16.msra.mxu1 %v4997_v31  ;;  %4689 = vmatprep.mubr.f32.mxu1 %v5756_v10 }
 0x185   : > { %5002 = vmatprep.subr.bf16.mxu1 %v4989_v26 }
 0x18b   : > { %4690 = vmatmul.mubr.f32.vlgmr.msra.gmra.mrb[0].mxu1 %v5781_v19 }
 0x18c   : > { %5004 = vmatpush3.bf16.msra.mxu1 %v4989_v26  ;;  %4696 = vmatprep.mubr.f32.mxu1 %v5759_v12 }
 0x18d   : > { %5006 = vmatprep.subr.bf16.mxu1 %v5005_v34 }
 0x193   : > { %4697 = vmatmul.mubr.f32.vlgmr.msra.gmra.mrb[0].mxu1 %v5784_v20 }
 0x194   : > { %5008 = vmatpush3.bf16.msra.mxu1 %v5005_v34  ;;  %4703 = vmatprep.mubr.f32.mxu1 %v5753_v7 }
 0x195   : > { %5010 = vmatprep.subr.bf16.mxu1 %v4989_v26 }
 0x19b   : > { %4704 = vmatmul.mubr.f32.vlgmr.msra.gmra.mrb[0].mxu1 %v5778_v18 }
 0x19c   : > { %5012 = vmatpush3.bf16.msra.mxu1 %v4989_v26  ;;  %4710 = vmatprep.mubr.f32.mxu1 %v5753_v7 }
 0x19d   : > { %v4754_v38 = vpop.f32.mrb[2].mxu0 }
 0x19e   : > { %v1761_v39 = vand.u32 4294901760, %v4754_v38  ;;  %v1747_v40 = vpop.f32.mrb[3].mxu0 }
 0x19f   : > { %v1758_v41 = vand.u32 4294901760, %v1747_v40 }
 0x1a0   : > { %v1853_v42 = vsub.f32 %v4754_v38, %v1761_v39 }
 0x1a1   : > { %v5037_v43 = vpack.c.bf16 %v1761_v39, %v1758_v41  ;;  %v1846_v44 = vsub.f32 %v1747_v40, %v1758_v41 }
 0x1a2   : > { %v1854_v45 = vand.u32 4294901760, %v1853_v42 }
 0x1a3   : > { %v1847_v46 = vand.u32 4294901760, %v1846_v44  ;;  %4711 = vmatmul.mubr.f32.vlgmr.msra.gmra.mrb[0].mxu1 %v5778_v18  ;;  %5038 = vmatprep.subr.bf16.mxu1 %v5037_v43  ;;  %v5045_v47 = vpack.c.bf16 %v1853_v42, %v1846_v44 }
 0x1a4   : > { %v1855_v48 = vsub.f32 %v1853_v42, %v1854_v45  ;;  %5040 = vmatpush3.bf16.msra.mxu1 %v5037_v43  ;;  %4759 = vmatprep.mubr.f32.mxu1 %v5765_v15 }
 0x1a5   : > { %v1848_v49 = vsub.f32 %v1846_v44, %v1847_v46  ;;  %v5053_v50 = vpack.c.bf16 %v1854_v45, %v1847_v46 }
 0x1a6   : > { %v1856_v51 = vand.u32 4294901760, %v1855_v48 }
 0x1a7   : > { %4760 = vmatmul.mubr.f32.vlgmr.msra.gmra.mrb[2].mxu1 %v5788_v30  ;;  %v1849_v52 = vand.u32 4294901760, %v1848_v49 }
 0x1a8   : > { %4766 = vmatprep.mubr.f32.mxu1 %v5753_v7 }
 0x1a9   : > { %v5041_v53 = vpack.c.bf16 %v1856_v51, %v1849_v52 }
 0x1ab   : > { %5042 = vmatprep.subr.bf16.mxu1 %v5041_v53 }
 0x1ac   : > { %5044 = vmatpush3.bf16.msra.mxu1 %v5041_v53 }
 0x1ad   : > { %5046 = vmatprep.subr.bf16.mxu1 %v5045_v47 }
 0x1af   : > { %4767 = vmatmul.mubr.f32.vlgmr.msra.gmra.mrb[2].mxu1 %v5778_v18 }
 0x1b0   : > { %5048 = vmatpush3.bf16.msra.mxu1 %v5045_v47  ;;  %4773 = vmatprep.mubr.f32.mxu1 %v5756_v10 }
 0x1b1   : > { %5050 = vmatprep.subr.bf16.mxu1 %v5037_v43 }
 0x1b7   : > { %4774 = vmatmul.mubr.f32.vlgmr.msra.gmra.mrb[2].mxu1 %v5781_v19 }
 0x1b8   : > { %5052 = vmatpush3.bf16.msra.mxu1 %v5037_v43  ;;  %4780 = vmatprep.mubr.f32.mxu1 %v5759_v12 }
 0x1b9   : > { %5054 = vmatprep.subr.bf16.mxu1 %v5053_v50 }
 0x1bf   : > { %4781 = vmatmul.mubr.f32.vlgmr.msra.gmra.mrb[2].mxu1 %v5784_v20 }
 0x1c0   : > { %5056 = vmatpush3.bf16.msra.mxu1 %v5053_v50  ;;  %4787 = vmatprep.mubr.f32.mxu1 %v5753_v7 }
 0x1c1   : > { %5058 = vmatprep.subr.bf16.mxu1 %v5037_v43 }
 0x1c7   : > { %4788 = vmatmul.mubr.f32.vlgmr.msra.gmra.mrb[2].mxu1 %v5778_v18 }
 0x1c8   : > { %5060 = vmatpush3.bf16.msra.mxu1 %v5037_v43  ;;  %4794 = vmatprep.mubr.f32.mxu1 %v5753_v7 }
 0x1c9   : > { %v4838_v54 = vpop.f32.mrb[4].mxu0 }
 0x1ca   : > { %v2777_v55 = vand.u32 4294901760, %v4838_v54  ;;  %v2763_v56 = vpop.f32.mrb[5].mxu0 }
 0x1cb   : > { %v2774_v57 = vand.u32 4294901760, %v2763_v56 }
 0x1cc   : > { %v2869_v58 = vsub.f32 %v4838_v54, %v2777_v55 }
 0x1cd   : > { %v5085_v59 = vpack.c.bf16 %v2777_v55, %v2774_v57  ;;  %v2862_v60 = vsub.f32 %v2763_v56, %v2774_v57 }
 0x1ce   : > { %v2870_v61 = vand.u32 4294901760, %v2869_v58 }
 0x1cf   : > { %v2863_v62 = vand.u32 4294901760, %v2862_v60  ;;  %4795 = vmatmul.mubr.f32.vlgmr.msra.gmra.mrb[2].mxu1 %v5778_v18  ;;  %5086 = vmatprep.subr.bf16.mxu1 %v5085_v59  ;;  %v5093_v63 = vpack.c.bf16 %v2869_v58, %v2862_v60 }
 0x1d0   : > { %v2871_v0 = vsub.f32 %v2869_v58, %v2870_v61  ;;  %5088 = vmatpush3.bf16.msra.mxu1 %v5085_v59  ;;  %4843 = vmatprep.mubr.f32.mxu1 %v5765_v15 }
 0x1d1   : > { %v2864_v1 = vsub.f32 %v2862_v60, %v2863_v62  ;;  %v5101_v2 = vpack.c.bf16 %v2870_v61, %v2863_v62 }
 0x1d2   : > { %v2872_v3 = vand.u32 4294901760, %v2871_v0 }
 0x1d3   : > { %4844 = vmatmul.mubr.f32.vlgmr.msra.gmra.mrb[4].mxu1 %v5788_v30  ;;  %v2865_v4 = vand.u32 4294901760, %v2864_v1 }
 0x1d4   : > { %4850 = vmatprep.mubr.f32.mxu1 %v5753_v7 }
 0x1d5   : > { %v5089_v5 = vpack.c.bf16 %v2872_v3, %v2865_v4 }
 0x1d7   : > { %5090 = vmatprep.subr.bf16.mxu1 %v5089_v5 }
 0x1d8   : > { %5092 = vmatpush3.bf16.msra.mxu1 %v5089_v5 }
 0x1d9   : > { %5094 = vmatprep.subr.bf16.mxu1 %v5093_v63 }
 0x1db   : > { %4851 = vmatmul.mubr.f32.vlgmr.msra.gmra.mrb[4].mxu1 %v5778_v18 }
 0x1dc   : > { %5096 = vmatpush3.bf16.msra.mxu1 %v5093_v63  ;;  %4857 = vmatprep.mubr.f32.mxu1 %v5756_v10 }
 0x1dd   : > { %5098 = vmatprep.subr.bf16.mxu1 %v5085_v59 }
 0x1e3   : > { %4858 = vmatmul.mubr.f32.vlgmr.msra.gmra.mrb[4].mxu1 %v5781_v19 }
 0x1e4   : > { %5100 = vmatpush3.bf16.msra.mxu1 %v5085_v59  ;;  %4864 = vmatprep.mubr.f32.mxu1 %v5759_v12 }
 0x1e5   : > { %5102 = vmatprep.subr.bf16.mxu1 %v5101_v2 }
 0x1eb   : > { %4865 = vmatmul.mubr.f32.vlgmr.msra.gmra.mrb[4].mxu1 %v5784_v20 }
 0x1ec   : > { %5104 = vmatpush3.bf16.msra.mxu1 %v5101_v2  ;;  %4871 = vmatprep.mubr.f32.mxu1 %v5753_v7 }
 0x1ed   : > { %5106 = vmatprep.subr.bf16.mxu1 %v5085_v59 }
 0x1f3   : > { %4872 = vmatmul.mubr.f32.vlgmr.msra.gmra.mrb[4].mxu1 %v5778_v18 }
 0x1f4   : > { %5108 = vmatpush3.bf16.msra.mxu1 %v5085_v59  ;;  %4878 = vmatprep.mubr.f32.mxu1 %v5753_v7 }
 0x1f5   : > { %v4922_v6 = vpop.f32.mrb[6].mxu0 }
 0x1f6   : > { %v3793_v8 = vand.u32 4294901760, %v4922_v6  ;;  %v3779_v11 = vpop.f32.mrb[7].mxu0 }
 0x1f7   : > { %v3790_v13 = vand.u32 4294901760, %v3779_v11 }
 0x1f8   : > { %v3885_v14 = vsub.f32 %v4922_v6, %v3793_v8 }
 0x1f9   : > { %v5133_v16 = vpack.c.bf16 %v3793_v8, %v3790_v13  ;;  %v3878_v17 = vsub.f32 %v3779_v11, %v3790_v13 }
 0x1fa   : > { %v3886_v21 = vand.u32 4294901760, %v3885_v14 }
 0x1fb   : > { %v3879_v22 = vand.u32 4294901760, %v3878_v17  ;;  %4879 = vmatmul.mubr.f32.vlgmr.msra.gmra.mrb[4].mxu1 %v5778_v18  ;;  %5134 = vmatprep.subr.bf16.mxu1 %v5133_v16  ;;  %v5141_v23 = vpack.c.bf16 %v3885_v14, %v3878_v17 }
 0x1fc   : > { %v3887_v24 = vsub.f32 %v3885_v14, %v3886_v21  ;;  %5136 = vmatpush3.bf16.msra.mxu1 %v5133_v16  ;;  %4927 = vmatprep.mubr.f32.mxu1 %v5765_v15 }
 0x1fd   : > { %v3880_v9 = vsub.f32 %v3878_v17, %v3879_v22  ;;  %v5149_v25 = vpack.c.bf16 %v3886_v21, %v3879_v22 }
 0x1fe   : > { %v3888_v26 = vand.u32 4294901760, %v3887_v24 }
 0x1ff   : > { %v3881_v27 = vand.u32 4294901760, %v3880_v9  ;;  %4928 = vmatmul.mubr.f32.vlgmr.msra.gmra.mrb[6].mxu1 %v5788_v30 }
 0x200   : > { %4934 = vmatprep.mubr.f32.mxu1 %v5753_v7 }
 0x201   : > { %v5137_v28 = vpack.c.bf16 %v3888_v26, %v3881_v27 }
 0x203   : > { %5138 = vmatprep.subr.bf16.mxu1 %v5137_v28 }
 0x204   : > { %5140 = vmatpush3.bf16.msra.mxu1 %v5137_v28 }
 0x205   : > { %5142 = vmatprep.subr.bf16.mxu1 %v5141_v23 }
 0x207   : > { %4935 = vmatmul.mubr.f32.vlgmr.msra.gmra.mrb[6].mxu1 %v5778_v18 }
 0x208   : > { %5144 = vmatpush3.bf16.msra.mxu1 %v5141_v23  ;;  %4941 = vmatprep.mubr.f32.mxu1 %v5756_v10 }
 0x209   : > { %5146 = vmatprep.subr.bf16.mxu1 %v5133_v16 }
 0x20f   : > { %4942 = vmatmul.mubr.f32.vlgmr.msra.gmra.mrb[6].mxu1 %v5781_v19 }
 0x210   : > { %5148 = vmatpush3.bf16.msra.mxu1 %v5133_v16  ;;  %4948 = vmatprep.mubr.f32.mxu1 %v5759_v12 }
 0x211   : > { %5150 = vmatprep.subr.bf16.mxu1 %v5149_v25 }
 0x217   : > { %4949 = vmatmul.mubr.f32.vlgmr.msra.gmra.mrb[6].mxu1 %v5784_v20 }
 0x218   : > { %5152 = vmatpush3.bf16.msra.mxu1 %v5149_v25  ;;  %4955 = vmatprep.mubr.f32.mxu1 %v5753_v7 }
 0x219   : > { %5154 = vmatprep.subr.bf16.mxu1 %v5133_v16 }
 0x21f   : > { %4956 = vmatmul.mubr.f32.vlgmr.msra.gmra.mrb[6].mxu1 %v5778_v18 }
 0x220   : > { %5156 = vmatpush3.bf16.msra.mxu1 %v5133_v16  ;;  %4962 = vmatprep.mubr.f32.mxu1 %v5753_v7 }
 0x227   : > { %4963 = vmatmul.mubr.f32.vlgmr.msra.gmra.mrb[6].mxu1 %v5778_v18 }
 0x276   : > { %v4712_v10 = vpop.f32.mrb[0].mxu1 }
 0x277   : > { %1245 = vst.msk [vmem:[%s218_s18 + $0x8] sm:$0xff] %vm227_vm0, %v4712_v10  ;;  %v1234_v12 = vpop.f32.mrb[1].mxu1 }
 0x278   : > { %1244 = vst.msk [vmem:[%s218_s18] sm:$0xff] %vm227_vm0, %v1234_v12 }
 0x2a2   : > { %v4796_v15 = vpop.f32.mrb[2].mxu1 }
 0x2a3   : > { %4418 = vst.msk [vmem:[%s218_s18 + $0x18] sm:$0xff] %vm227_vm0, %v4796_v15  ;;  %v2249_v19 = vpop.f32.mrb[3].mxu1 }
 0x2a4   : > { %4417 = vst.msk [vmem:[%s218_s18 + $0x10] sm:$0xff] %vm227_vm0, %v2249_v19 }
 0x2ce   : > { %v4880_v7 = vpop.f32.mrb[4].mxu1 }
 0x2cf   : > { %4422 = vst.msk [vmem:[%s218_s18 + $0x28] sm:$0xff] %vm227_vm0, %v4880_v7  ;;  %v3265_v18 = vpop.f32.mrb[5].mxu1 }
 0x2d0   : > { %4421 = vst.msk [vmem:[%s218_s18 + $0x20] sm:$0xff] %vm227_vm0, %v3265_v18 }
 0x2fa   : > { %v4964_v20 = vpop.f32.mrb[6].mxu1 }
 0x2fb   : > { %4426 = vst.msk [vmem:[%s218_s18 + $0x38] sm:$0xff] %vm227_vm0, %v4964_v20  ;;  %v4281_v29 = vpop.f32.mrb[7].mxu1 }
 0x2fc   : > { %4425 = vst.msk [vmem:[%s218_s18 + $0x30] sm:$0xff] %vm227_vm0, %v4281_v29 }
 0x2fd   : > { %5407 = shalt.err (!%p5404_p1)
}
 0x2fe   : > { %s5408_s10 = scalar_lea.hbm %s5851_s27, 1024  ;;  %s5412_s26 = scalar_lea.hbm %s5900_s3, 2048 }
 0x2ff   : > { %p5409_p13 = scmp.ne.s32.totalorder %s5851_s27, %s5408_s10  ;;  %p5413_p4 = scmp.lt.u32.totalorder %s5851_s27, %s5900_s3 }
 0x300   : > { %p5414_p5 = scmp.lt.u32.totalorder %s5412_s26, %s5408_s10  ;;  %p5416_p11 = scmp.lt.u32.totalorder %s5408_s10, %s5851_s27 }
 0x301   : > { %p5410_p6 = pnand %p5409_p13, %p5914_p0 }
 0x302   : > { %p5415_p8 = por %p5414_p5, %p5413_p4 }
 0x303   : > { %p5411_p10 = pneg %p5410_p6 }
 0x304   : > { %p5417_p2 = por %p5416_p11, %p5415_p8 }
 0x306   : > { %p5418_p3 = pnand %p5417_p2, %p5411_p10 }
 0x308   : > { %5421 = shalt.err (!%p5418_p3)
}
 0x309   : > { %s5472_s28 = smov 128   ;;  %s5473_s18 = smov 8  }
 0x30a   : > { %5247 = dma.vmem_to_hbm [thread:$0]  (%p5914_p0), %s5846_s20, 1024, %s5851_s27, %s4295_s22, %s5472_s28, %s5472_s28, %s5473_s18  }
 0x30b PF: > { %s4324_s7 = sand.u32 1, %s5452_s12   ;;  %p5915_p7 = scmp.ne.s32.totalorder %s5905_s19, 0 }
 0x30c   : > { %p5916_p9 = scmp.ge.s32.totalorder %s5464_s15, 2  ;;  %s4325_s8 = scalar_lea.sflag [#allocation4], %s4324_s7 }
 0x30e   : > { %p5261_p12 = pnand %p5916_p9, %p5915_p7 }
 0x310   : > { %5447 = dma.done.wait (!%p5261_p12), %s4325_s8, 1024  }
 0x311   : > { %5449 = vsyncadd (!%p5261_p12), %s4325_s8, 4294966272  ;;  %p17_p1 = scmp.ge.s32.totalorder %s5610_s23, 4   ;;  %s5917_s12 = smov %s5456_s13 }
 0x312   : > { %s5918_s13 = smov %s5460_s14  ;;  %s5919_s14 = smov %s5626_s9 }
 0x313   : > { %s5920_s15 = smov %s5610_s23  ;;  %19 = sbr.rel (!%p17_p1) target bundleno = 6 (0x6), region = 91 }
 0x31a   :  { %4330 = vsyncpa [#allocation3], 1 }
 0x31b   :  { %4332 = vsyncpa [#allocation3 + $0x1], 1 }
 0x31c   :  { %4333 = vsyncpa [#allocation6], 1 }
 0x31d   :  { %4334 = vsyncpa [#allocation4], 1 }
 0x31e   :  { %4336 = vsyncpa [#allocation4 + $0x1], 1 }

</bundles_post_ra>
